<compile_context>
chip_gen: v5e
topology: v5e:2x2
jax: 0.10.0
libtpu: 0.0.40
codegen_flags: <defaults>
</compile_context>

<pallas_src>
import math
from functools import partial

import jax
import jax.numpy as jnp
from jax.experimental import pallas as pl
from jax.experimental.pallas import tpu as pltpu

L = 32            # config.input_size (embed dim of attention / experts)
NUM_CLASSES = 3
EPS = 1e-5        # nn.LayerNorm default eps

_VMEM = pl.BlockSpec(memory_space=pltpu.MemorySpace.VMEM)


def _round8(v):
    return ((v + 7) // 8) * 8


# ----------------------------------------------------------------------------
# In-kernel helpers (fp32 accumulation everywhere)
# ----------------------------------------------------------------------------
def _mm(a, b):
    return jnp.dot(a, b, preferred_element_type=jnp.float32)


def _mm_t(a, b):
    # (M, D) x (N, D) -> (M, N): contract last dims, no materialized b.T.
    return jax.lax.dot_general(a, b, (((1,), (1,)), ((), ())),
                               preferred_element_type=jnp.float32)


def _softmax_rows(s):
    m = jnp.max(s, axis=-1, keepdims=True)
    e = jnp.exp(s - m)
    return e * pl.reciprocal(jnp.sum(e, axis=-1, keepdims=True), approx=True)


def _normalize(x):
    mu = jnp.mean(x, axis=-1, keepdims=True)
    var = jnp.mean((x - mu) ** 2, axis=-1, keepdims=True)
    return (x - mu) * jax.lax.rsqrt(var + EPS)


# ----------------------------------------------------------------------------
# Fused forward kernel (3 slab inputs, 1 packed output)
# ----------------------------------------------------------------------------
def vila_mil_kernel(w_ref, b_ref, x_ref, out_ref, *, ns, nl):
    C = NUM_CLASSES
    n = ns + nl
    t_row = _round8(n)          # text features start (8-aligned)
    oh_row = t_row + 8          # one-hot start (8-aligned)
    NEG = jnp.float32(-1e30)

    # ---- unpack activation slab -------------------------------------------
    xall = x_ref[...]                                  # (rows, L)
    x = xall[0:n]                                      # (n, L)  [low; high] tokens
    t = xall[t_row:t_row + 2 * C]                      # (2C, L) [t_low; t_high]
    onehot = xall[oh_row:oh_row + C, 0:C]              # (C, C)

    # ---- unpack weight / bias slabs (8-aligned, full-lane-width ref reads) -
    w1 = w_ref[0:L, :]                 # lanes: [wq|wk|wv | wo]  of attention 1
    w2 = w_ref[L:2 * L, :]             # lanes: [wk2|wv2|wq2|wo2] of attention 2
    we1 = w_ref[2 * L:3 * L, :]        # lanes: [expert layer-1 fused (3L) | 0]
    we2 = w_ref[3 * L:7 * L, :]        # (128,128) block-diag expert layer-2 (zero padded)

    ball = b_ref[...]                                  # (8, 128)
    b_a1 = ball[0:1, :]                                # [bq|bk|bv | bo]  (attn 1)
    b_a2 = ball[1:2, :]                                # [bk2|bv2|bq2|bo2] (attn 2)
    gamma = ball[2:3, 0:L]
    beta = ball[2:3, L:2 * L]
    b_e1 = ball[3:4, :]                                # fused expert layer-1 bias | 0
    b_e2 = ball[4:5, :]                                # expert layer-2 bias        | 0

    # ---- cross_attention_1: fused QKV matmul + block-masked softmax --------
    qkv = _mm(x, w1) + b_a1                            # (n, 128): [q|k|v|junk]
    q, k, v = qkv[:, 0:L], qkv[:, L:2 * L], qkv[:, 2 * L:3 * L]
    s = _mm_t(q, k)                                    # (n, n), 1/sqrt(L) folded into wq
    ri = jax.lax.broadcasted_iota(jnp.int32, (n, n), 0)
    ci = jax.lax.broadcasted_iota(jnp.int32, (n, n), 1)
    same = ((ri < ns) & (ci < ns)) | ((ri >= ns) & (ci >= ns))
    p = _softmax_rows(jnp.where(same, s, NEG))
    attn = _mm(_mm(p, v), w1[:, 3 * L:4 * L]) + b_a1[:, 3 * L:4 * L]   # out proj

    # ---- residual + shared LayerNorm (self.norm) ----------------------------
    comp = _normalize(attn + x) * gamma + beta         # (n, L)

    # ---- experts: fused LN+Linear1+ReLU (L->3L), per-stream token mean,
    #      block-diagonal Linear2 as one (2,128)x(128,128) matmul -------------
    h = jnp.maximum(_mm(_normalize(comp), we1) + b_e1, 0.0)            # (n, 128)
    hbar = jnp.concatenate(
        [jnp.mean(h[0:ns], axis=0, keepdims=True),
         jnp.mean(h[ns:n], axis=0, keepdims=True)], axis=0)            # (2, 128)
    dense = _mm(hbar, we2) + b_e2                                      # (2, 128)
    dense_lo = jnp.concatenate(
        [dense[0:1, c * L:(c + 1) * L] for c in range(C)], axis=0)     # (C, L)
    dense_hi = jnp.concatenate(
        [dense[1:2, c * L:(c + 1) * L] for c in range(C)], axis=0)     # (C, L)

    # ---- cross_attention_2: text queries over [comp; M] per stream ----------
    ctx = jnp.concatenate([comp[0:ns], x[0:ns], comp[ns:n], x[ns:n]], axis=0)  # (2n, L)
    kv = _mm(ctx, w2) + b_a2                           # (2n, 128): [k2|v2|junk]
    k2, v2 = kv[:, 0:L], kv[:, L:2 * L]
    q2 = (_mm(t, w2) + b_a2)[:, 2 * L:3 * L]           # (2C, L), scale folded into wq2
    s2 = _mm_t(q2, k2)                                 # (2C, 2n)
    ri2 = jax.lax.broadcasted_iota(jnp.int32, (2 * C, 2 * n), 0)
    ci2 = jax.lax.broadcasted_iota(jnp.int32, (2 * C, 2 * n), 1)
    same2 = ((ri2 < C) & (ci2 < 2 * ns)) | ((ri2 >= C) & (ci2 >= 2 * ns))
    p2 = _softmax_rows(jnp.where(same2, s2, NEG))
    t_out = _mm(_mm(p2, v2), w2[:, 3 * L:4 * L]) + b_a2[:, 3 * L:4 * L] + t    # (2C, L)

    # ---- head: logits, exact softmax, cross-entropy -------------------------
    logits = _mm_t(dense_lo, t_out[0:C]) + _mm_t(dense_hi, t_out[C:2 * C])     # (C, C)
    m = jnp.max(logits, axis=-1, keepdims=True)
    e = jnp.exp(logits - m)
    ssum = jnp.sum(e, axis=-1, keepdims=True)
    probs = e / ssum                                   # exact (matches torch softmax)
    lse = m + jnp.log(ssum)
    picked = jnp.sum(onehot * logits, axis=-1, keepdims=True)
    loss = jnp.mean(lse - picked, axis=0, keepdims=True)                       # (1, 1)
    out_ref[...] = jnp.concatenate([probs, jnp.broadcast_to(loss, (1, C))], axis=0)


# ----------------------------------------------------------------------------
# Parameters (PyTorch-layout synthetic init, shapes follow ViLa_MIL_Model)
# ----------------------------------------------------------------------------
def init_params(key):
    ks = iter(jax.random.split(key, 32))

    def w(shape, scale=0.05):
        return (scale * jax.random.normal(next(ks), shape)).astype(jnp.float32)

    def attn_params():
        # nn.MultiheadAttention: in_proj split into q/k/v, out_proj; all (out, in).
        return dict(wq=w((L, L)), wk=w((L, L)), wv=w((L, L)),
                    bq=w((1, L)), bk=w((1, L)), bv=w((1, L)),
                    wo=w((L, L)), bo=w((1, L)))

    return {
        "ca1": attn_params(),                     # cross_attention_1 (shared low/high)
        "ca2": attn_params(),                     # cross_attention_2
        "norm": dict(gamma=jnp.ones((1, L), jnp.float32),
                     beta=jnp.zeros((1, L), jnp.float32)),
        "experts": dict(
            ln_g=jnp.ones((NUM_CLASSES, L), jnp.float32),
            ln_b=jnp.zeros((NUM_CLASSES, L), jnp.float32),
            w1=w((NUM_CLASSES, L, L)), b1=w((NUM_CLASSES, L)),
            w2=w((NUM_CLASSES, L, L)), b2=w((NUM_CLASSES, L)),
        ),
        # TODO(synk): CLIP prompt_learner + text_encoder output, synthesized.
        "text_features": w((2 * NUM_CLASSES, L)),
    }


def pack_params(p):
    """One-time host-side folding into two (8,128)-aligned kernel slabs:
    transpose to (in,out), fold 1/sqrt(L) into wq/bq, fold per-expert LN
    affines into the experts' first Linear, fuse q|k|v (and k2|v2|q2|o2,
    expert layer-1) along lanes, build a block-diagonal expert layer-2."""
    C = NUM_CLASSES
    scale = 1.0 / math.sqrt(L)                    # num_heads = 1 -> head_dim = L
    a1, a2 = p["ca1"], p["ca2"]

    wqkv1 = jnp.concatenate([a1["wq"].T * scale, a1["wk"].T, a1["wv"].T], axis=1)   # (L,3L)
    bqkv1 = jnp.concatenate([a1["bq"] * scale, a1["bk"], a1["bv"]], axis=1)         # (1,3L)

    e = p["experts"]
    w1t = jnp.transpose(e["w1"], (0, 2, 1))       # (C, in, out)
    w2t = jnp.transpose(e["w2"], (0, 2, 1))       # (C, in, out)
    # expert_c(x) layer1: ReLU( xhat @ (diag(g_c) @ W1_c^T) + (b_c @ W1_c^T + b1_c) )
    w1f = jnp.concatenate([e["ln_g"][c][:, None] * w1t[c] for c in range(C)], axis=1)   # (L,3L)
    b1f = jnp.concatenate([e["ln_b"][c][None, :] @ w1t[c] + e["b1"][c][None, :]
                           for c in range(C)], axis=1)                                  # (1,3L)
    w2bd = jax.scipy.linalg.block_diag(*[w2t[c] for c in range(C)])                     # (3L,3L)
    b2f = e["b2"].reshape(1, C * L)                                                     # (1,3L)

    # ---- weight slab: (224, 128) ----
    W = jnp.zeros((7 * L, 4 * L), jnp.float32)
    W = W.at[0:L, 0:3 * L].set(wqkv1)
    W = W.at[0:L, 3 * L:4 * L].set(a1["wo"].T)
    W = W.at[L:2 * L, 0:L].set(a2["wk"].T)
    W = W.at[L:2 * L, L:2 * L].set(a2["wv"].T)
    W = W.at[L:2 * L, 2 * L:3 * L].set(a2["wq"].T * scale)
    W = W.at[L:2 * L, 3 * L:4 * L].set(a2["wo"].T)
    W = W.at[2 * L:3 * L, 0:3 * L].set(w1f)
    W = W.at[3 * L:6 * L, 0:3 * L].set(w2bd)

    # ---- bias / LayerNorm slab: (8, 128) ----
    B = jnp.zeros((8, 4 * L), jnp.float32)
    B = B.at[0:1, 0:3 * L].set(bqkv1)
    B = B.at[0:1, 3 * L:4 * L].set(a1["bo"])
    B = B.at[1:2, 0:L].set(a2["bk"])
    B = B.at[1:2, L:2 * L].set(a2["bv"])
    B = B.at[1:2, 2 * L:3 * L].set(a2["bq"] * scale)
    B = B.at[1:2, 3 * L:4 * L].set(a2["bo"])
    B = B.at[2:3, 0:L].set(p["norm"]["gamma"])
    B = B.at[2:3, L:2 * L].set(p["norm"]["beta"])
    B = B.at[3:4, 0:3 * L].set(b1f)
    B = B.at[4:5, 0:3 * L].set(b2f)

    return dict(W=W, B=B, T=p["text_features"])


# ----------------------------------------------------------------------------
# Forward pass: one fused Pallas kernel + trivial host-side argmax
# ----------------------------------------------------------------------------
@jax.jit
def vila_mil_forward(kp, x_s, x_l, label):
    C = NUM_CLASSES
    ns, nl = x_s.shape[0], x_l.shape[0]
    n = ns + nl
    t_row = _round8(n)
    oh_row = t_row + 8
    total = oh_row + 8

    onehot = jax.nn.one_hot(label, C, dtype=jnp.float32)

    # Per-call activation slab: [x_s; x_l; pad; text_low/high; pad; one-hot; pad]
    X = jnp.zeros((total, L), jnp.float32)
    X = X.at[0:ns].set(x_s.astype(jnp.float32))
    X = X.at[ns:n].set(x_l.astype(jnp.float32))
    X = X.at[t_row:t_row + 2 * C].set(kp["T"])
    X = X.at[oh_row:oh_row + C, 0:C].set(onehot)

    out = pl.pallas_call(
        partial(vila_mil_kernel, ns=ns, nl=nl),
        out_shape=jax.ShapeDtypeStruct((C + 1, C), jnp.float32),
        in_specs=[_VMEM, _VMEM, _VMEM],
        out_specs=_VMEM,
    )(kp["W"], kp["B"], X)

    probs = out[0:C, :]
    loss = out[C, 0]
    y_hat = jnp.argmax(probs, axis=1)             # torch.topk(probs, 1)[1].squeeze(1)
    return probs, y_hat, loss


if __name__ == "__main__":
    key = jax.random.PRNGKey(0)
    kparam, kx1, kx2, kl = jax.random.split(key, 4)
    params = init_params(kparam)
    kparams = pack_params(params)                 # one-time host-side prep

    N_s, N_l = 8, 16                              # low-res / high-res patch counts
    x_s = jax.random.normal(kx1, (N_s, L), jnp.float32)
    x_l = jax.random.normal(kx2, (N_l, L), jnp.float32)
    # logits are (C, C) in the reference, so CE targets are (C,) class ids
    label = jax.random.randint(kl, (NUM_CLASSES,), 0, NUM_CLASSES)

    probs, y_hat, loss = vila_mil_forward(kparams, x_s, x_l, label)
    jax.block_until_ready((probs, y_hat, loss))
    print("KERNEL_OK")
</pallas_src>

<mosaic_0001>
module attributes {stable_mosaic.version = 11 : i64} {
  func.func @vila_mil_kernel(%arg0: memref<224x128xf32, #tpu.memory_space<vmem>>, %arg1: memref<8x128xf32, #tpu.memory_space<vmem>>, %arg2: memref<40x32xf32, #tpu.memory_space<vmem>>, %arg3: memref<4x3xf32, #tpu.memory_space<vmem>>) attributes {dimension_semantics = [], scalar_prefetch = 0 : i64, scratch_operands = 0 : i64, tpu.core_type = #tpu.core_type<tc>} {
    %c0 = arith.constant 0 : index
    %c0_0 = arith.constant 0 : index
    %0 = vector.load %arg2[%c0, %c0_0] : memref<40x32xf32, #tpu.memory_space<vmem>>, vector<40x32xf32>
    %1 = vector.extract_strided_slice %0 {offsets = [0, 0], sizes = [24, 32], strides = [1, 1]} : vector<40x32xf32> to vector<24x32xf32>
    %2 = vector.extract_strided_slice %0 {offsets = [24, 0], sizes = [6, 32], strides = [1, 1]} : vector<40x32xf32> to vector<6x32xf32>
    %3 = vector.extract_strided_slice %0 {offsets = [32, 0], sizes = [3, 3], strides = [1, 1]} : vector<40x32xf32> to vector<3x3xf32>
    %c0_1 = arith.constant 0 : index
    %c0_2 = arith.constant 0 : index
    %4 = vector.load %arg0[%c0_1, %c0_2] : memref<224x128xf32, #tpu.memory_space<vmem>>, vector<32x128xf32>
    %c32 = arith.constant 32 : index
    %c0_3 = arith.constant 0 : index
    %5 = vector.load %arg0[%c32, %c0_3] : memref<224x128xf32, #tpu.memory_space<vmem>>, vector<32x128xf32>
    %c64 = arith.constant 64 : index
    %c0_4 = arith.constant 0 : index
    %6 = vector.load %arg0[%c64, %c0_4] : memref<224x128xf32, #tpu.memory_space<vmem>>, vector<32x128xf32>
    %c96 = arith.constant 96 : index
    %c0_5 = arith.constant 0 : index
    %7 = vector.load %arg0[%c96, %c0_5] : memref<224x128xf32, #tpu.memory_space<vmem>>, vector<128x128xf32>
    %c0_6 = arith.constant 0 : index
    %c0_7 = arith.constant 0 : index
    %8 = vector.load %arg1[%c0_6, %c0_7] : memref<8x128xf32, #tpu.memory_space<vmem>>, vector<8x128xf32>
    %9 = vector.extract_strided_slice %8 {offsets = [0, 0], sizes = [1, 128], strides = [1, 1]} : vector<8x128xf32> to vector<1x128xf32>
    %10 = vector.extract_strided_slice %8 {offsets = [1, 0], sizes = [1, 128], strides = [1, 1]} : vector<8x128xf32> to vector<1x128xf32>
    %11 = vector.extract_strided_slice %8 {offsets = [2, 0], sizes = [1, 32], strides = [1, 1]} : vector<8x128xf32> to vector<1x32xf32>
    %12 = vector.extract_strided_slice %8 {offsets = [2, 32], sizes = [1, 32], strides = [1, 1]} : vector<8x128xf32> to vector<1x32xf32>
    %13 = vector.extract_strided_slice %8 {offsets = [3, 0], sizes = [1, 128], strides = [1, 1]} : vector<8x128xf32> to vector<1x128xf32>
    %14 = vector.extract_strided_slice %8 {offsets = [4, 0], sizes = [1, 128], strides = [1, 1]} : vector<8x128xf32> to vector<1x128xf32>
    %cst = arith.constant dense<0.000000e+00> : vector<24x128xf32>
    %15 = tpu.matmul %1, %4, %cst {dimension_numbers = #tpu.dot_dimension_numbers<[1], [0], [0], [1], [0, 0, 1, 1], [], []>} : vector<24x32xf32>, vector<32x128xf32>, vector<24x128xf32> -> vector<24x128xf32>
    %16 = vector.broadcast %9 : vector<1x128xf32> to vector<24x128xf32>
    %17 = arith.addf %15, %16 : vector<24x128xf32>
    %18 = vector.extract_strided_slice %17 {offsets = [0, 0], sizes = [24, 32], strides = [1, 1]} : vector<24x128xf32> to vector<24x32xf32>
    %19 = vector.extract_strided_slice %17 {offsets = [0, 32], sizes = [24, 32], strides = [1, 1]} : vector<24x128xf32> to vector<24x32xf32>
    %20 = vector.extract_strided_slice %17 {offsets = [0, 64], sizes = [24, 32], strides = [1, 1]} : vector<24x128xf32> to vector<24x32xf32>
    %cst_8 = arith.constant dense<0.000000e+00> : vector<24x24xf32>
    %21 = tpu.matmul %18, %19, %cst_8 {dimension_numbers = #tpu.dot_dimension_numbers<[1], [1], [0], [0], [0, 0, 1, 0], [], []>} : vector<24x32xf32>, vector<24x32xf32>, vector<24x24xf32> -> vector<24x24xf32>
    %22 = tpu.iota {dimensions = array<i32: 0>} : vector<24x24xi32>
    %23 = tpu.iota {dimensions = array<i32: 1>} : vector<24x24xi32>
    %c8_i32 = arith.constant 8 : i32
    %24 = vector.broadcast %c8_i32 : i32 to vector<24x24xi32>
    %25 = arith.cmpi slt, %22, %24 : vector<24x24xi32>
    %c8_i32_9 = arith.constant 8 : i32
    %26 = vector.broadcast %c8_i32_9 : i32 to vector<24x24xi32>
    %27 = arith.cmpi slt, %23, %26 : vector<24x24xi32>
    %28 = arith.andi %25, %27 : vector<24x24xi1>
    %c8_i32_10 = arith.constant 8 : i32
    %29 = vector.broadcast %c8_i32_10 : i32 to vector<24x24xi32>
    %30 = arith.cmpi sge, %22, %29 : vector<24x24xi32>
    %c8_i32_11 = arith.constant 8 : i32
    %31 = vector.broadcast %c8_i32_11 : i32 to vector<24x24xi32>
    %32 = arith.cmpi sge, %23, %31 : vector<24x24xi32>
    %33 = arith.andi %30, %32 : vector<24x24xi1>
    %34 = arith.ori %28, %33 : vector<24x24xi1>
    %cst_12 = arith.constant -1.000000e+30 : f32
    %35 = vector.broadcast %cst_12 : f32 to vector<24x24xf32>
    %36 = arith.select %34, %21, %35 : vector<24x24xi1>, vector<24x24xf32>
    %cst_13 = arith.constant dense<0xFF800000> : vector<24xf32>
    %37 = vector.multi_reduction <maximumf>, %36, %cst_13 [1] : vector<24x24xf32> to vector<24xf32>
    %38 = vector.shape_cast %37 : vector<24xf32> to vector<24x1xf32>
    %39 = vector.broadcast %38 : vector<24x1xf32> to vector<24x24xf32>
    %40 = arith.subf %36, %39 : vector<24x24xf32>
    %41 = math.exp %40 : vector<24x24xf32>
    %cst_14 = arith.constant dense<0.000000e+00> : vector<24xf32>
    %42 = vector.multi_reduction <add>, %41, %cst_14 [1] : vector<24x24xf32> to vector<24xf32>
    %43 = vector.shape_cast %42 : vector<24xf32> to vector<24x1xf32>
    %44 = tpu.reciprocal %43 {approx = true} : vector<24x1xf32> -> vector<24x1xf32>
    %45 = vector.broadcast %44 : vector<24x1xf32> to vector<24x24xf32>
    %46 = arith.mulf %41, %45 : vector<24x24xf32>
    %cst_15 = arith.constant dense<0.000000e+00> : vector<24x32xf32>
    %47 = tpu.matmul %46, %20, %cst_15 {dimension_numbers = #tpu.dot_dimension_numbers<[1], [0], [0], [1], [0, 0, 1, 1], [], []>} : vector<24x24xf32>, vector<24x32xf32>, vector<24x32xf32> -> vector<24x32xf32>
    %48 = vector.extract_strided_slice %4 {offsets = [0, 96], sizes = [32, 32], strides = [1, 1]} : vector<32x128xf32> to vector<32x32xf32>
    %cst_16 = arith.constant dense<0.000000e+00> : vector<24x32xf32>
    %49 = tpu.matmul %47, %48, %cst_16 {dimension_numbers = #tpu.dot_dimension_numbers<[1], [0], [0], [1], [0, 0, 1, 1], [], []>} : vector<24x32xf32>, vector<32x32xf32>, vector<24x32xf32> -> vector<24x32xf32>
    %50 = vector.extract_strided_slice %9 {offsets = [0, 96], sizes = [1, 32], strides = [1, 1]} : vector<1x128xf32> to vector<1x32xf32>
    %51 = vector.broadcast %50 : vector<1x32xf32> to vector<24x32xf32>
    %52 = arith.addf %49, %51 : vector<24x32xf32>
    %53 = arith.addf %52, %1 : vector<24x32xf32>
    %cst_17 = arith.constant dense<0.000000e+00> : vector<24xf32>
    %54 = vector.multi_reduction <add>, %53, %cst_17 [1] : vector<24x32xf32> to vector<24xf32>
    %55 = vector.shape_cast %54 : vector<24xf32> to vector<24x1xf32>
    %cst_18 = arith.constant 3.200000e+01 : f32
    %56 = vector.broadcast %cst_18 : f32 to vector<24x1xf32>
    %57 = arith.divf %55, %56 : vector<24x1xf32>
    %58 = vector.broadcast %57 : vector<24x1xf32> to vector<24x32xf32>
    %59 = arith.subf %53, %58 : vector<24x32xf32>
    %60 = arith.mulf %59, %59 : vector<24x32xf32>
    %cst_19 = arith.constant dense<0.000000e+00> : vector<24xf32>
    %61 = vector.multi_reduction <add>, %60, %cst_19 [1] : vector<24x32xf32> to vector<24xf32>
    %62 = vector.shape_cast %61 : vector<24xf32> to vector<24x1xf32>
    %cst_20 = arith.constant 3.200000e+01 : f32
    %63 = vector.broadcast %cst_20 : f32 to vector<24x1xf32>
    %64 = arith.divf %62, %63 : vector<24x1xf32>
    %65 = vector.broadcast %57 : vector<24x1xf32> to vector<24x32xf32>
    %66 = arith.subf %53, %65 : vector<24x32xf32>
    %cst_21 = arith.constant 9.99999974E-6 : f32
    %67 = vector.broadcast %cst_21 : f32 to vector<24x1xf32>
    %68 = arith.addf %64, %67 : vector<24x1xf32>
    %69 = math.rsqrt %68 : vector<24x1xf32>
    %70 = vector.broadcast %69 : vector<24x1xf32> to vector<24x32xf32>
    %71 = arith.mulf %66, %70 : vector<24x32xf32>
    %72 = vector.broadcast %11 : vector<1x32xf32> to vector<24x32xf32>
    %73 = arith.mulf %71, %72 : vector<24x32xf32>
    %74 = vector.broadcast %12 : vector<1x32xf32> to vector<24x32xf32>
    %75 = arith.addf %73, %74 : vector<24x32xf32>
    %cst_22 = arith.constant dense<0.000000e+00> : vector<24xf32>
    %76 = vector.multi_reduction <add>, %75, %cst_22 [1] : vector<24x32xf32> to vector<24xf32>
    %77 = vector.shape_cast %76 : vector<24xf32> to vector<24x1xf32>
    %cst_23 = arith.constant 3.200000e+01 : f32
    %78 = vector.broadcast %cst_23 : f32 to vector<24x1xf32>
    %79 = arith.divf %77, %78 : vector<24x1xf32>
    %80 = vector.broadcast %79 : vector<24x1xf32> to vector<24x32xf32>
    %81 = arith.subf %75, %80 : vector<24x32xf32>
    %82 = arith.mulf %81, %81 : vector<24x32xf32>
    %cst_24 = arith.constant dense<0.000000e+00> : vector<24xf32>
    %83 = vector.multi_reduction <add>, %82, %cst_24 [1] : vector<24x32xf32> to vector<24xf32>
    %84 = vector.shape_cast %83 : vector<24xf32> to vector<24x1xf32>
    %cst_25 = arith.constant 3.200000e+01 : f32
    %85 = vector.broadcast %cst_25 : f32 to vector<24x1xf32>
    %86 = arith.divf %84, %85 : vector<24x1xf32>
    %87 = vector.broadcast %79 : vector<24x1xf32> to vector<24x32xf32>
    %88 = arith.subf %75, %87 : vector<24x32xf32>
    %cst_26 = arith.constant 9.99999974E-6 : f32
    %89 = vector.broadcast %cst_26 : f32 to vector<24x1xf32>
    %90 = arith.addf %86, %89 : vector<24x1xf32>
    %91 = math.rsqrt %90 : vector<24x1xf32>
    %92 = vector.broadcast %91 : vector<24x1xf32> to vector<24x32xf32>
    %93 = arith.mulf %88, %92 : vector<24x32xf32>
    %cst_27 = arith.constant dense<0.000000e+00> : vector<24x128xf32>
    %94 = tpu.matmul %93, %6, %cst_27 {dimension_numbers = #tpu.dot_dimension_numbers<[1], [0], [0], [1], [0, 0, 1, 1], [], []>} : vector<24x32xf32>, vector<32x128xf32>, vector<24x128xf32> -> vector<24x128xf32>
    %95 = vector.broadcast %13 : vector<1x128xf32> to vector<24x128xf32>
    %96 = arith.addf %94, %95 : vector<24x128xf32>
    %cst_28 = arith.constant 0.000000e+00 : f32
    %97 = vector.broadcast %cst_28 : f32 to vector<24x128xf32>
    %98 = arith.maximumf %96, %97 : vector<24x128xf32>
    %99 = vector.extract_strided_slice %98 {offsets = [0, 0], sizes = [8, 128], strides = [1, 1]} : vector<24x128xf32> to vector<8x128xf32>
    %cst_29 = arith.constant dense<0.000000e+00> : vector<128xf32>
    %100 = vector.multi_reduction <add>, %99, %cst_29 [0] : vector<8x128xf32> to vector<128xf32>
    %101 = vector.shape_cast %100 : vector<128xf32> to vector<1x128xf32>
    %cst_30 = arith.constant 8.000000e+00 : f32
    %102 = vector.broadcast %cst_30 : f32 to vector<1x128xf32>
    %103 = arith.divf %101, %102 : vector<1x128xf32>
    %104 = vector.extract_strided_slice %98 {offsets = [8, 0], sizes = [16, 128], strides = [1, 1]} : vector<24x128xf32> to vector<16x128xf32>
    %cst_31 = arith.constant dense<0.000000e+00> : vector<128xf32>
    %105 = vector.multi_reduction <add>, %104, %cst_31 [0] : vector<16x128xf32> to vector<128xf32>
    %106 = vector.shape_cast %105 : vector<128xf32> to vector<1x128xf32>
    %cst_32 = arith.constant 1.600000e+01 : f32
    %107 = vector.broadcast %cst_32 : f32 to vector<1x128xf32>
    %108 = arith.divf %106, %107 : vector<1x128xf32>
    %109 = tpu.concatenate %103, %108 in 0 : vector<1x128xf32>, vector<1x128xf32> -> vector<2x128xf32>
    %cst_33 = arith.constant dense<0.000000e+00> : vector<2x128xf32>
    %110 = tpu.matmul %109, %7, %cst_33 {dimension_numbers = #tpu.dot_dimension_numbers<[1], [0], [0], [1], [0, 0, 1, 1], [], []>} : vector<2x128xf32>, vector<128x128xf32>, vector<2x128xf32> -> vector<2x128xf32>
    %111 = vector.broadcast %14 : vector<1x128xf32> to vector<2x128xf32>
    %112 = arith.addf %110, %111 : vector<2x128xf32>
    %113 = vector.extract_strided_slice %112 {offsets = [0, 0], sizes = [1, 32], strides = [1, 1]} : vector<2x128xf32> to vector<1x32xf32>
    %114 = vector.extract_strided_slice %112 {offsets = [0, 32], sizes = [1, 32], strides = [1, 1]} : vector<2x128xf32> to vector<1x32xf32>
    %115 = vector.extract_strided_slice %112 {offsets = [0, 64], sizes = [1, 32], strides = [1, 1]} : vector<2x128xf32> to vector<1x32xf32>
    %116 = tpu.concatenate %113, %114, %115 in 0 : vector<1x32xf32>, vector<1x32xf32>, vector<1x32xf32> -> vector<3x32xf32>
    %117 = vector.extract_strided_slice %112 {offsets = [1, 0], sizes = [1, 32], strides = [1, 1]} : vector<2x128xf32> to vector<1x32xf32>
    %118 = vector.extract_strided_slice %112 {offsets = [1, 32], sizes = [1, 32], strides = [1, 1]} : vector<2x128xf32> to vector<1x32xf32>
    %119 = vector.extract_strided_slice %112 {offsets = [1, 64], sizes = [1, 32], strides = [1, 1]} : vector<2x128xf32> to vector<1x32xf32>
    %120 = tpu.concatenate %117, %118, %119 in 0 : vector<1x32xf32>, vector<1x32xf32>, vector<1x32xf32> -> vector<3x32xf32>
    %121 = vector.extract_strided_slice %75 {offsets = [0, 0], sizes = [8, 32], strides = [1, 1]} : vector<24x32xf32> to vector<8x32xf32>
    %122 = vector.extract_strided_slice %1 {offsets = [0, 0], sizes = [8, 32], strides = [1, 1]} : vector<24x32xf32> to vector<8x32xf32>
    %123 = vector.extract_strided_slice %75 {offsets = [8, 0], sizes = [16, 32], strides = [1, 1]} : vector<24x32xf32> to vector<16x32xf32>
    %124 = vector.extract_strided_slice %1 {offsets = [8, 0], sizes = [16, 32], strides = [1, 1]} : vector<24x32xf32> to vector<16x32xf32>
    %125 = tpu.concatenate %121, %122, %123, %124 in 0 : vector<8x32xf32>, vector<8x32xf32>, vector<16x32xf32>, vector<16x32xf32> -> vector<48x32xf32>
    %cst_34 = arith.constant dense<0.000000e+00> : vector<48x128xf32>
    %126 = tpu.matmul %125, %5, %cst_34 {dimension_numbers = #tpu.dot_dimension_numbers<[1], [0], [0], [1], [0, 0, 1, 1], [], []>} : vector<48x32xf32>, vector<32x128xf32>, vector<48x128xf32> -> vector<48x128xf32>
    %127 = vector.broadcast %10 : vector<1x128xf32> to vector<48x128xf32>
    %128 = arith.addf %126, %127 : vector<48x128xf32>
    %129 = vector.extract_strided_slice %128 {offsets = [0, 0], sizes = [48, 32], strides = [1, 1]} : vector<48x128xf32> to vector<48x32xf32>
    %130 = vector.extract_strided_slice %128 {offsets = [0, 32], sizes = [48, 32], strides = [1, 1]} : vector<48x128xf32> to vector<48x32xf32>
    %cst_35 = arith.constant dense<0.000000e+00> : vector<6x128xf32>
    %131 = tpu.matmul %2, %5, %cst_35 {dimension_numbers = #tpu.dot_dimension_numbers<[1], [0], [0], [1], [0, 0, 1, 1], [], []>} : vector<6x32xf32>, vector<32x128xf32>, vector<6x128xf32> -> vector<6x128xf32>
    %132 = vector.broadcast %10 : vector<1x128xf32> to vector<6x128xf32>
    %133 = arith.addf %131, %132 : vector<6x128xf32>
    %134 = vector.extract_strided_slice %133 {offsets = [0, 64], sizes = [6, 32], strides = [1, 1]} : vector<6x128xf32> to vector<6x32xf32>
    %cst_36 = arith.constant dense<0.000000e+00> : vector<6x48xf32>
    %135 = tpu.matmul %134, %129, %cst_36 {dimension_numbers = #tpu.dot_dimension_numbers<[1], [1], [0], [0], [0, 0, 1, 0], [], []>} : vector<6x32xf32>, vector<48x32xf32>, vector<6x48xf32> -> vector<6x48xf32>
    %136 = tpu.iota {dimensions = array<i32: 0>} : vector<6x48xi32>
    %137 = tpu.iota {dimensions = array<i32: 1>} : vector<6x48xi32>
    %c3_i32 = arith.constant 3 : i32
    %138 = vector.broadcast %c3_i32 : i32 to vector<6x48xi32>
    %139 = arith.cmpi slt, %136, %138 : vector<6x48xi32>
    %c16_i32 = arith.constant 16 : i32
    %140 = vector.broadcast %c16_i32 : i32 to vector<6x48xi32>
    %141 = arith.cmpi slt, %137, %140 : vector<6x48xi32>
    %142 = arith.andi %139, %141 : vector<6x48xi1>
    %c3_i32_37 = arith.constant 3 : i32
    %143 = vector.broadcast %c3_i32_37 : i32 to vector<6x48xi32>
    %144 = arith.cmpi sge, %136, %143 : vector<6x48xi32>
    %c16_i32_38 = arith.constant 16 : i32
    %145 = vector.broadcast %c16_i32_38 : i32 to vector<6x48xi32>
    %146 = arith.cmpi sge, %137, %145 : vector<6x48xi32>
    %147 = arith.andi %144, %146 : vector<6x48xi1>
    %148 = arith.ori %142, %147 : vector<6x48xi1>
    %cst_39 = arith.constant -1.000000e+30 : f32
    %149 = vector.broadcast %cst_39 : f32 to vector<6x48xf32>
    %150 = arith.select %148, %135, %149 : vector<6x48xi1>, vector<6x48xf32>
    %cst_40 = arith.constant dense<0xFF800000> : vector<6xf32>
    %151 = vector.multi_reduction <maximumf>, %150, %cst_40 [1] : vector<6x48xf32> to vector<6xf32>
    %152 = vector.shape_cast %151 : vector<6xf32> to vector<6x1xf32>
    %153 = vector.broadcast %152 : vector<6x1xf32> to vector<6x48xf32>
    %154 = arith.subf %150, %153 : vector<6x48xf32>
    %155 = math.exp %154 : vector<6x48xf32>
    %cst_41 = arith.constant dense<0.000000e+00> : vector<6xf32>
    %156 = vector.multi_reduction <add>, %155, %cst_41 [1] : vector<6x48xf32> to vector<6xf32>
    %157 = vector.shape_cast %156 : vector<6xf32> to vector<6x1xf32>
    %158 = tpu.reciprocal %157 {approx = true} : vector<6x1xf32> -> vector<6x1xf32>
    %159 = vector.broadcast %158 : vector<6x1xf32> to vector<6x48xf32>
    %160 = arith.mulf %155, %159 : vector<6x48xf32>
    %cst_42 = arith.constant dense<0.000000e+00> : vector<6x32xf32>
    %161 = tpu.matmul %160, %130, %cst_42 {dimension_numbers = #tpu.dot_dimension_numbers<[1], [0], [0], [1], [0, 0, 1, 1], [], []>} : vector<6x48xf32>, vector<48x32xf32>, vector<6x32xf32> -> vector<6x32xf32>
    %162 = vector.extract_strided_slice %5 {offsets = [0, 96], sizes = [32, 32], strides = [1, 1]} : vector<32x128xf32> to vector<32x32xf32>
    %cst_43 = arith.constant dense<0.000000e+00> : vector<6x32xf32>
    %163 = tpu.matmul %161, %162, %cst_43 {dimension_numbers = #tpu.dot_dimension_numbers<[1], [0], [0], [1], [0, 0, 1, 1], [], []>} : vector<6x32xf32>, vector<32x32xf32>, vector<6x32xf32> -> vector<6x32xf32>
    %164 = vector.extract_strided_slice %10 {offsets = [0, 96], sizes = [1, 32], strides = [1, 1]} : vector<1x128xf32> to vector<1x32xf32>
    %165 = vector.broadcast %164 : vector<1x32xf32> to vector<6x32xf32>
    %166 = arith.addf %163, %165 : vector<6x32xf32>
    %167 = arith.addf %166, %2 : vector<6x32xf32>
    %168 = vector.extract_strided_slice %167 {offsets = [0, 0], sizes = [3, 32], strides = [1, 1]} : vector<6x32xf32> to vector<3x32xf32>
    %cst_44 = arith.constant dense<0.000000e+00> : vector<3x3xf32>
    %169 = tpu.matmul %116, %168, %cst_44 {dimension_numbers = #tpu.dot_dimension_numbers<[1], [1], [0], [0], [0, 0, 1, 0], [], []>} : vector<3x32xf32>, vector<3x32xf32>, vector<3x3xf32> -> vector<3x3xf32>
    %170 = vector.extract_strided_slice %167 {offsets = [3, 0], sizes = [3, 32], strides = [1, 1]} : vector<6x32xf32> to vector<3x32xf32>
    %cst_45 = arith.constant dense<0.000000e+00> : vector<3x3xf32>
    %171 = tpu.matmul %120, %170, %cst_45 {dimension_numbers = #tpu.dot_dimension_numbers<[1], [1], [0], [0], [0, 0, 1, 0], [], []>} : vector<3x32xf32>, vector<3x32xf32>, vector<3x3xf32> -> vector<3x3xf32>
    %172 = arith.addf %169, %171 : vector<3x3xf32>
    %cst_46 = arith.constant dense<0xFF800000> : vector<3xf32>
    %173 = vector.multi_reduction <maximumf>, %172, %cst_46 [1] : vector<3x3xf32> to vector<3xf32>
    %174 = vector.shape_cast %173 : vector<3xf32> to vector<3x1xf32>
    %175 = vector.broadcast %174 : vector<3x1xf32> to vector<3x3xf32>
    %176 = arith.subf %172, %175 : vector<3x3xf32>
    %177 = math.exp %176 : vector<3x3xf32>
    %cst_47 = arith.constant dense<0.000000e+00> : vector<3xf32>
    %178 = vector.multi_reduction <add>, %177, %cst_47 [1] : vector<3x3xf32> to vector<3xf32>
    %179 = vector.shape_cast %178 : vector<3xf32> to vector<3x1xf32>
    %180 = vector.broadcast %179 : vector<3x1xf32> to vector<3x3xf32>
    %181 = arith.divf %177, %180 : vector<3x3xf32>
    %182 = math.log %179 : vector<3x1xf32>
    %183 = arith.addf %174, %182 : vector<3x1xf32>
    %184 = arith.mulf %3, %172 : vector<3x3xf32>
    %cst_48 = arith.constant dense<0.000000e+00> : vector<3xf32>
    %185 = vector.multi_reduction <add>, %184, %cst_48 [1] : vector<3x3xf32> to vector<3xf32>
    %186 = vector.shape_cast %185 : vector<3xf32> to vector<3x1xf32>
    %187 = arith.subf %183, %186 : vector<3x1xf32>
    %cst_49 = arith.constant dense<0.000000e+00> : vector<1xf32>
    %188 = vector.multi_reduction <add>, %187, %cst_49 [0] : vector<3x1xf32> to vector<1xf32>
    %189 = vector.shape_cast %188 : vector<1xf32> to vector<1x1xf32>
    %cst_50 = arith.constant 3.000000e+00 : f32
    %190 = vector.broadcast %cst_50 : f32 to vector<1x1xf32>
    %191 = arith.divf %189, %190 : vector<1x1xf32>
    %192 = vector.shape_cast %191 : vector<1x1xf32> to vector<1x1xf32>
    %193 = vector.broadcast %192 : vector<1x1xf32> to vector<1x3xf32>
    %194 = tpu.concatenate %181, %193 in 0 : vector<3x3xf32>, vector<1x3xf32> -> vector<4x3xf32>
    %c0_51 = arith.constant 0 : index
    %c0_52 = arith.constant 0 : index
    %195 = vector.load %arg3[%c0_51, %c0_52] : memref<4x3xf32, #tpu.memory_space<vmem>>, vector<4x3xf32>
    tpu.vector_store %arg3[%c0_51, %c0_52], %194 {strides = array<i32>} : memref<4x3xf32, #tpu.memory_space<vmem>>, vector<4x3xf32>,
    return
  }
}

</mosaic_0001>

<bundles_post_ra>
// kernel: vila_mil_forward.1
= control target key start
LH: loop header
LB: loop body
LE: loop exit
PB: predicated region body
PF: predicated region fallthrough
CT: control target
= control target key end

     0   :  { %8 = vsyncpa [#allocation3], 0  ;;  %s1059_s15 = smov [#allocation2]   ;;  %s1060_s17 = smov 128   ;;  %s1349_s0 = inlined_call_operand.hbm [shape: f32[224,128], index: 0, kind: input, shape index: {}]   ;;  %s1350_s1 = inlined_call_operand.vmem [shape: f32[8,128], index: 1, kind: input, shape index: {}]   ;;  %s1351_s2 = inlined_call_operand.vmem [shape: f32[40,32], index: 2, kind: input, shape index: {}]   ;;  %s1352_s3 = inlined_call_operand.vmem [shape: f32[4,3], index: 3, kind: output, shape index: {}]  }
   0x1   :  { %s13_s14 = sshll.u32 %s1349_s0, 4  ;;  %s15_s16 = sshll.u32 %s1059_s15, 4  ;;  %s14_s14 = int_to_ptr.hbm [resolvable:$true] %s13_s14  ;;  %s16_s16 = int_to_ptr.vmem [resolvable:$true] %s15_s16 }
   0x2   :  { %s1061_s18 = smov 8  }
   0x3   :  { %21 = dma.hbm_to_vmem [thread:$0]  %s14_s14, 3584, %s16_s16, [#allocation3], %s1060_s17, %s1060_s17, %s1061_s18  }
   0x4   :  { %1057 = dma.done.wait [#allocation3], 3584  }
   0x5   :  { %1058 = vsyncadd [#allocation3], 4294963712  ;;  %v1092_v0 = vld [vmem:[#allocation2 + $0x18] sm:$0xff]  ;;  %v1094_v1 = vld [vmem:[#allocation2 + $0x10] sm:$0xff]  ;;  %vm65_vm0 = vcmask 261120   ;;  %s1062_s26 = smov 96   ;;  %v148_v20 = vlaneseq }
   0x6   :  { %87 = vmatpush.msra.mxu0 %v1092_v0  ;;  %v956_v2 = vpack.i.bf16 %v1094_v1, %v1092_v0  ;;  %v1099_v3 = vld [vmem:[#allocation2 + $0x8] sm:$0xff]  ;;  %v1101_v4 = vld [vmem:[#allocation2] sm:$0xff]  ;;  %v1125_v8 = vld [vmem:[%s1351_s2 + $0x10] sm:$0xff]  ;;  %vm174_vm2 = vcmask 195584   ;;  %s1064_s27 = smov 32  }
   0x7   :  { %v961_v5 = vpack.i.bf16 %v1101_v4, %v1099_v3  ;;  %v1110_v6 = vld [vmem:[%s1351_s2] sm:$0xff]  ;;  %v1118_v7 = vld [vmem:[%s1351_s2 + $0x8] sm:$0xff]  ;;  %v1150_v21 = vand.u32 127, %v148_v20 }
   0x8   :  { %88 = vmatpush.msra.mxu0 %v1094_v1  ;;  %v1132_v9 = vld [vmem:[%s1350_s1] sm:$0xff]  ;;  %s1063_s1 = smov 64  }
   0x9   :  { %v1135_v10 = vperm.slane %v1132_v9, 0  ;;  %vm157_vm1 = vcmp.lt.s32.totalorder %v1150_v21, 8  ;;  %vm164_vm3 = vcmp.ge.s32.totalorder %v1150_v21, 8 }
   0xa   :  { %89 = vmatpush.msra.mxu0 %v1099_v3 }
   0xc   :  { %90 = vmatpush.msra.mxu0 %v1101_v4 }
   0xd   :  { %899 = vmatmul.msk.f32.vlgmr.msra.gmra.mxu0 %vm65_vm0, %v1110_v6 }
  0x15   :  { %900 = vmatmul.msk.f32.gmra.mxu0 %vm65_vm0, %v1118_v7 }
  0x1d   :  { %901 = vmatmul.msk.f32.gmra.mxu0 %vm65_vm0, %v1125_v8 }
  0x8a   :  { %v92_v11 = vpop.f32.mrf.mxu0 }
  0x8b   :  { %v93_v12 = vadd.f32 %v92_v11, %v1135_v10 }
  0x8d   :  { %104 = vrot.lane.b32.xlu1 %v93_v12, %s1062_s26 }
  0x92   :  { %v95_v13 = vpop.f32.mrf.mxu0 }
  0x93   :  { %v96_v16 = vadd.f32 %v95_v13, %v1135_v10 }
  0x9a   :  { %v98_v14 = vpop.f32.mrf.mxu0 }
  0x9b   :  { %v99_v15 = vadd.f32 %v98_v14, %v1135_v10 }
  0x9d   :  { %108 = vrot.lane.b32.xlu0 %v99_v15, %s1062_s26  ;;  %v951_v31 = vpack.i.bf16 %v96_v16, %v99_v15 }
  0xa5   :  { %106 = vrot.lane.b32.xlu0 %v96_v16, %s1062_s26 }
  0xff   :  { %v105_v19 = vpop.permute.xlu1 %104 }
 0x10f   :  { %v109_v17 = vpop.permute.xlu0 %108 }
 0x110   :  { %902 = vmatpush.xpose.msk.msra.mxu1 %vm65_vm0, %v109_v17 }
 0x117   :  { %v107_v18 = vpop.permute.xlu0 %106 }
 0x118   :  { %903 = vmatpush.xpose.msk.msra.mxu1 %vm65_vm0, %v107_v18 }
 0x11c   :  { %904 = vmatpush.xpose.msk.msra.mxu1 %vm65_vm0, %v105_v19 }
 0x11f   :  { %905 = vmatmul.msk.f32.vlgmr.msra.gmra.mxu1 %vm65_vm0, %v93_v12 }
 0x127   :  { %906 = vmatmul.msk.f32.gmra.mxu1 %vm65_vm0, %v96_v16 }
 0x12f   :  { %907 = vmatmul.msk.f32.gmra.mxu1 %vm65_vm0, %v99_v15 }
 0x19c   :  { %v139_v22 = vpop.f32.mrf.mxu1 }
 0x19d   :  { %v171_v23 = vsel %vm157_vm1, %v139_v22, -1e+30 }
 0x19e   :  { %v175_v24 = vsel %vm174_vm2, %v171_v23, -inf }
 0x19f   :  { %176 = vmax.xlane.f32.xlu1 %v175_v24  ;;  %v1065_v24 = vmov 32.0  }
 0x1a4   :  { %v142_v25 = vpop.f32.mrf.mxu1 }
 0x1a5   :  { %v172_v26 = vsel %vm164_vm3, %v142_v25, -1e+30 }
 0x1a6   :  { %v178_v27 = vsel %vm174_vm2, %v172_v26, -inf }
 0x1a7   :  { %179 = vmax.xlane.f32.xlu2 %v178_v27 }
 0x1ac   :  { %v145_v28 = vpop.f32.mrf.mxu1 }
 0x1ad   :  { %v173_v29 = vsel %vm164_vm3, %v145_v28, -1e+30 }
 0x1ae   :  { %v181_v30 = vsel %vm174_vm2, %v173_v29, -inf }
 0x1af   :  { %182 = vmax.xlane.f32.xlu2 %v181_v30 }
 0x1c7   :  { %952 = vrot.lane.b32.xlu2 %v951_v31, %s1063_s1 }
 0x1cf   :  { %208 = vrot.lane.b32.xlu2 %v93_v12, %s1063_s1 }
 0x212   :  { %v177_v32 = vpop.xlane.xlu1 %176 }
 0x213   :  { %v184_v33 = vsub.f32 %v171_v23, %v177_v32 }
 0x215   :  { %v187_v34 = vmul.f32 1.442695, %v184_v33 }
 0x217   :  { %991 = vpow2.f32 %v187_v34 }
 0x21a   :  { %v180_v35 = vpop.xlane.xlu2 %179 }
 0x21b   :  { %v185_v36 = vsub.f32 %v172_v26, %v180_v35 }
 0x21d   :  { %v992_v37 = vpop.eup %991  ;;  %v189_v38 = vmul.f32 1.442695, %v185_v36 }
 0x21e   :  { %v193_v39 = vsel %vm174_vm2, %v992_v37, 0.0 }
 0x21f   :  { %993 = vpow2.f32 %v189_v38  ;;  %194 = vadd.xlane.f32.xlu0 %v193_v39 }
 0x222   :  { %v183_v40 = vpop.xlane.xlu2 %182 }
 0x223   :  { %v186_v41 = vsub.f32 %v173_v29, %v183_v40 }
 0x225   :  { %v994_v42 = vpop.eup %993  ;;  %v191_v43 = vmul.f32 1.442695, %v186_v41 }
 0x226   :  { %v196_v44 = vsel %vm174_vm2, %v994_v42, 0.0 }
 0x227   :  { %995 = vpow2.f32 %v191_v43  ;;  %197 = vadd.xlane.f32.xlu2 %v196_v44 }
 0x22a   :  { %v953_v45 = vpop.permute.xlu2 %952 }
 0x22b   :  { %v954_v46 = vunpack.i.l.bf16 %v953_v45  ;;  %v955_v48 = vunpack.i.h.bf16 %v953_v45 }
 0x22d   :  { %v996_v47 = vpop.eup %995  ;;  %239 = vmatpush.msra.mxu2 %v954_v46  ;;  %v1201_v46 = vperm.slane %v1132_v9, 2 }
 0x22e   :  { %v199_v49 = vsel %vm174_vm2, %v996_v47, 0.0 }
 0x22f   :  { %200 = vadd.xlane.f32.xlu1 %v199_v49  ;;  %240 = vmatpush.msra.mxu2 %v955_v48  ;;  %v1209_v48 = vld [vmem:[#allocation2 + $0x30] sm:$0xff]  ;;  %v1213_v49 = vld [vmem:[#allocation2 + $0x28] sm:$0xff] }
 0x232   :  { %v209_v50 = vpop.permute.xlu2 %208 }
 0x233   :  { %241 = vmatpush.msra.mxu2 %v209_v50  ;;  %957 = vrot.lane.b32.xlu0 %v956_v2, %s1064_s27  ;;  %v1217_v50 = vld [vmem:[#allocation2 + $0x20] sm:$0xff] }
 0x23b   :  { %269 = vrot.lane.b32.xlu0 %v1135_v10, %s1064_s27 }
 0x248   :  { %962 = vrot.lane.b32.xlu1 %v961_v5, %s1064_s27 }
 0x292   :  { %v195_v51 = vpop.xlane.xlu0 %194 }
 0x293   :  { %997 = vrcp.f32 %v195_v51 }
 0x299   :  { %v998_v52 = vpop.eup %997 }
 0x29a   :  { %v198_v53 = vpop.xlane.xlu2 %197  ;;  %v205_v54 = vmul.f32 %v998_v52, %v992_v37 }
 0x29b   :  { %999 = vrcp.f32 %v198_v53 }
 0x29c   :  { %908 = vmatmul.msk.f32.vlgmr.msra.gmra.mxu2 %vm174_vm2, %v205_v54 }
 0x2a1   :  { %v1000_v55 = vpop.eup %999 }
 0x2a2   :  { %v201_v56 = vpop.xlane.xlu1 %200  ;;  %v206_v57 = vmul.f32 %v1000_v55, %v994_v42 }
 0x2a3   :  { %1001 = vrcp.f32 %v201_v56 }
 0x2a4   :  { %909 = vmatmul.msk.f32.gmra.mxu2 %vm174_vm2, %v206_v57  ;;  %1003 = vrcp.f32 %v1065_v24 }
 0x2a5   :  { %v958_v58 = vpop.permute.xlu0 %957 }
 0x2a6   :  { %v959_v59 = vunpack.i.l.bf16 %v958_v58  ;;  %v960_v60 = vunpack.i.h.bf16 %v958_v58 }
 0x2a8   :  { %293 = vmatpush.msrb.mxu2 %v959_v59  ;;  %937 = vmatpush.msra.mxu3 %v959_v59 }
 0x2a9   :  { %v1002_v61 = vpop.eup %1001 }
 0x2aa   :  { %v207_v62 = vmul.f32 %v1002_v61, %v996_v47  ;;  %294 = vmatpush.msrb.mxu2 %v960_v60  ;;  %938 = vmatpush.msra.mxu3 %v960_v60  ;;  %v1004_v25 = vpop.eup %1003  ;;  %v1205_v47 = vld [vmem:[#allocation2 + $0x38] sm:$0xff] }
 0x2ab   :  { %v320_v26 = vmul.f32 32.0, %v1004_v25  ;;  %vm324_vm4 = vweird.f32 %v1004_v25  ;;  %633 = vmatpush.msrb.mxu1 %v1205_v47 }
 0x2ac   :  { %910 = vmatmul.msk.f32.gmra.mxu2 %vm174_vm2, %v207_v62 }
 0x2ad   :  { %v270_v5 = vpop.permute.xlu0 %269  ;;  %v321_v27 = vsub.f32 1.0, %v320_v26  ;;  %634 = vmatpush.msrb.mxu1 %v1209_v48 }
 0x2af   :  { %v322_v28 = vmul.f32 %v1004_v25, %v321_v27  ;;  %635 = vmatpush.msrb.mxu1 %v1213_v49 }
 0x2b1   :  { %v323_v29 = vadd.f32 %v1004_v25, %v322_v28  ;;  %636 = vmatpush.msrb.mxu1 %v1217_v50 }
 0x2b3   :  { %v1184_v30 = vsel %vm324_vm4, %v1004_v25, %v323_v29 }
 0x2ba   :  { %v963_v63 = vpop.permute.xlu1 %962 }
 0x2bb   :  { %v964_v0 = vunpack.i.l.bf16 %v963_v63  ;;  %v965_v1 = vunpack.i.h.bf16 %v963_v63 }
 0x2bd   :  { %295 = vmatpush.msrb.mxu2 %v964_v0  ;;  %939 = vmatpush.msra.mxu3 %v964_v0 }
 0x2bf   :  { %296 = vmatpush.msrb.mxu2 %v965_v1  ;;  %940 = vmatpush.msra.mxu3 %v965_v1 }
 0x2c1   :  { %595 = vmatpush.msrb.mxu3 %v1205_v47 }
 0x2c3   :  { %596 = vmatpush.msrb.mxu3 %v1209_v48 }
 0x2c5   :  { %597 = vmatpush.msrb.mxu3 %v1213_v49 }
 0x2c7   :  { %598 = vmatpush.msrb.mxu3 %v1217_v50 }
 0x31f   :  { %v243_v2 = vpop.f32.mrf.mxu2 }
 0x320   :  { %911 = vmatmul.msk.f32.vlgmr.msrb.gmra.mxu2 %vm65_vm0, %v243_v2 }
 0x327   :  { %v246_v3 = vpop.f32.mrf.mxu2 }
 0x328   :  { %912 = vmatmul.msk.f32.vlgmr.msra.gmra.mxu3 %vm65_vm0, %v246_v3 }
 0x32f   :  { %v249_v4 = vpop.f32.mrf.mxu2 }
 0x330   :  { %913 = vmatmul.msk.f32.gmra.mxu3 %vm65_vm0, %v249_v4 }
 0x3a3   :  { %v298_v10 = vpop.f32.mrf.mxu2 }
 0x3a4   :  { %v299_v11 = vadd.f32 %v298_v10, %v270_v5 }
 0x3a6   :  { %v307_v12 = vadd.f32 %v299_v11, %v1110_v6 }
 0x3a8   :  { %v310_v13 = vsel %vm65_vm0, %v307_v12, 0.0 }
 0x3a9   :  { %311 = vadd.xlane.f32.xlu1 %v310_v13 }
 0x3ab   :  { %v301_v14 = vpop.f32.mrf.mxu3 }
 0x3ac   :  { %v302_v15 = vadd.f32 %v301_v14, %v270_v5 }
 0x3ae   :  { %v308_v16 = vadd.f32 %v302_v15, %v1118_v7 }
 0x3b0   :  { %v313_v17 = vsel %vm65_vm0, %v308_v16, 0.0 }
 0x3b1   :  { %314 = vadd.xlane.f32.xlu0 %v313_v17 }
 0x3b3   :  { %v304_v18 = vpop.f32.mrf.mxu3 }
 0x3b4   :  { %v305_v19 = vadd.f32 %v304_v18, %v270_v5 }
 0x3b6   :  { %v309_v22 = vadd.f32 %v305_v19, %v1125_v8 }
 0x3b8   :  { %v316_v23 = vsel %vm65_vm0, %v309_v22, 0.0 }
 0x3b9   :  { %317 = vadd.xlane.f32.xlu2 %v316_v23 }
 0x41c   :  { %v312_v31 = vpop.xlane.xlu1 %311 }
 0x41d   :  { %v326_v32 = vmul.f32 %v1184_v30, %v312_v31 }
 0x41f   :  { %v329_v33 = vsub.f32 %v307_v12, %v326_v32  ;;  %v1235_v32 = vld [vmem:[%s1351_s2 + $0x18] sm:$0xff] }
 0x420   :  { %923 = vmatmul.msk.f32.vlgmr.msrb.gmra.mxu1 %vm65_vm0, %v1235_v32 }
 0x421   :  { %v332_v34 = vmul.f32 %v329_v33, %v329_v33 }
 0x423   :  { %v335_v35 = vsel %vm65_vm0, %v332_v34, 0.0 }
 0x424   :  { %v315_v36 = vpop.xlane.xlu0 %314  ;;  %336 = vadd.xlane.f32.xlu2 %v335_v35 }
 0x425   :  { %v327_v37 = vmul.f32 %v1184_v30, %v315_v36 }
 0x427   :  { %v1189_v38 = vsub.f32 %v308_v16, %v327_v37 }
 0x429   :  { %v333_v39 = vmul.f32 %v1189_v38, %v1189_v38 }
 0x42b   :  { %v338_v40 = vsel %vm65_vm0, %v333_v39, 0.0 }
 0x42c   :  { %v318_v41 = vpop.xlane.xlu2 %317  ;;  %339 = vadd.xlane.f32.xlu2 %v338_v40 }
 0x42d   :  { %v328_v42 = vmul.f32 %v1184_v30, %v318_v41 }
 0x42f   :  { %v1195_v43 = vsub.f32 %v309_v22, %v328_v42 }
 0x431   :  { %v334_v44 = vmul.f32 %v1195_v43, %v1195_v43 }
 0x433   :  { %v341_v45 = vsel %vm65_vm0, %v334_v44, 0.0 }
 0x434   :  { %342 = vadd.xlane.f32.xlu2 %v341_v45 }
 0x44c   :  { %388 = vrot.lane.b32.xlu2 %v1201_v46, %s1062_s26 }
 0x497   :  { %v337_v51 = vpop.xlane.xlu2 %336 }
 0x498   :  { %v344_v52 = vmul.f32 %v337_v51, %v1184_v30  ;;  %v46_v51 = vld [vmem:[#allocation2 + $0x58] sm:$0xff] }
 0x499   :  { %482 = vmatpush.msra.mxu2 %v46_v51 }
 0x49a   :  { %v347_v53 = vadd.f32 1e-05, %v344_v52  ;;  %v45_v52 = vld [vmem:[#allocation2 + $0x50] sm:$0xff] }
 0x49b   :  { %483 = vmatpush.msra.mxu2 %v45_v52 }
 0x49c   :  { %1005 = vrsqrt.f32 %v347_v53  ;;  %vm356_vm6 = vweird.f32 %v347_v53 }
 0x49f   :  { %v340_v54 = vpop.xlane.xlu2 %339 }
 0x4a0   :  { %v345_v55 = vmul.f32 %v340_v54, %v1184_v30  ;;  %v44_v54 = vld [vmem:[#allocation2 + $0x48] sm:$0xff] }
 0x4a1   :  { %484 = vmatpush.msra.mxu2 %v44_v54 }
 0x4a2   :  { %v1006_v56 = vpop.eup %1005  ;;  %v348_v57 = vadd.f32 1e-05, %v345_v55 }
 0x4a3   :  { %v351_v58 = vmul.f32 %v1006_v56, %v347_v53  ;;  %vm357_vm5 = vweird.f32 %v1006_v56 }
 0x4a4   :  { %1007 = vrsqrt.f32 %v348_v57  ;;  %vm358_vm7 = vmor %vm356_vm6, %vm357_vm5  ;;  %vm366_vm9 = vweird.f32 %v348_v57 }
 0x4a5   :  { %v352_v59 = vmul.f32 %v1006_v56, %v351_v58 }
 0x4a7   :  { %v353_v60 = vmul.f32 0.5, %v352_v59  ;;  %v343_v61 = vpop.xlane.xlu2 %342  ;;  %v43_v59 = vld [vmem:[#allocation2 + $0x40] sm:$0xff] }
 0x4a8   :  { %v346_v62 = vmul.f32 %v343_v61, %v1184_v30  ;;  %485 = vmatpush.msra.mxu2 %v43_v59  ;;  %v1267_v61 = vperm.slane %v1132_v9, 1  ;;  %v61_v59 = vld [vmem:[#allocation2 + $0xd0] sm:$0xff] }
 0x4a9   :  { %v354_v63 = vsub.f32 1.5, %v353_v60 }
 0x4aa   :  { %v1008_v0 = vpop.eup %1007  ;;  %v349_v1 = vadd.f32 1e-05, %v346_v62 }
 0x4ab   :  { %v355_v2 = vmul.f32 %v1006_v56, %v354_v63  ;;  %v361_v3 = vmul.f32 %v1008_v0, %v348_v57  ;;  %vm367_vm8 = vweird.f32 %v1008_v0 }
 0x4ac   :  { %1009 = vrsqrt.f32 %v349_v1  ;;  %vm368_vm10 = vmor %vm366_vm9, %vm367_vm8  ;;  %vm376_vm12 = vweird.f32 %v349_v1  ;;  %vm685_vm9 = vcmp.lt.s32.totalorder %v1150_v21, 16 }
 0x4ad   :  { %v362_v4 = vmul.f32 %v1008_v0, %v361_v3  ;;  %v359_v5 = vsel %vm358_vm7, %v1006_v56, %v355_v2  ;;  %v638_v2 = vpop.f32.mrf.mxu1 }
 0x4ae   :  { %v380_v10 = vmul.f32 %v359_v5, %v329_v33  ;;  %v639_v3 = vadd.f32 %v638_v2, %v1267_v61  ;;  %v58_v2 = vld [vmem:[#allocation2 + $0xb8] sm:$0xff] }
 0x4af   :  { %v363_v11 = vmul.f32 0.5, %v362_v4  ;;  %v389_v12 = vpop.permute.xlu2 %388 }
 0x4b0   :  { %v384_v13 = vmul.f32 %v1201_v46, %v380_v10  ;;  %642 = vrot.lane.b32.xlu2 %v639_v3, %s1063_s1  ;;  %v56_v3 = vld [vmem:[#allocation2 + $0xa8] sm:$0xff] }
 0x4b1   :  { %v364_v14 = vsub.f32 1.5, %v363_v11 }
 0x4b2   :  { %v1010_v15 = vpop.eup %1009  ;;  %v391_v16 = vadd.f32 %v389_v12, %v384_v13 }
 0x4b3   :  { %v365_v17 = vmul.f32 %v1008_v0, %v364_v14  ;;  %v371_v18 = vmul.f32 %v1010_v15, %v349_v1  ;;  %vm377_vm11 = vweird.f32 %v1010_v15 }
 0x4b4   :  { %917 = vmatmul.msk.f32.vlgmr.msrb.gmra.mxu3 %vm65_vm0, %v391_v16  ;;  %v394_v19 = vsel %vm65_vm0, %v391_v16, 0.0  ;;  %vm378_vm13 = vmor %vm376_vm12, %vm377_vm11  ;;  %vm688_vm11 = vcmp.ge.s32.totalorder %v1150_v21, 16 }
 0x4b5   :  { %v372_v22 = vmul.f32 %v1010_v15, %v371_v18  ;;  %v369_v23 = vsel %vm368_vm10, %v1008_v0, %v365_v17  ;;  %395 = vadd.xlane.f32.xlu1 %v394_v19 }
 0x4b6   :  { %v381_v24 = vmul.f32 %v369_v23, %v1189_v38 }
 0x4b7   :  { %v373_v25 = vmul.f32 0.5, %v372_v22 }
 0x4b8   :  { %v385_v26 = vmul.f32 %v1201_v46, %v381_v24 }
 0x4b9   :  { %v374_v27 = vsub.f32 1.5, %v373_v25 }
 0x4ba   :  { %v392_v28 = vadd.f32 %v389_v12, %v385_v26 }
 0x4bb   :  { %v375_v29 = vmul.f32 %v1010_v15, %v374_v27 }
 0x4bc   :  { %918 = vmatmul.msk.f32.gmra.mxu3 %vm65_vm0, %v1110_v6  ;;  %v397_v31 = vsel %vm65_vm0, %v392_v28, 0.0 }
 0x4bd   :  { %v379_v33 = vsel %vm378_vm13, %v1010_v15, %v375_v29  ;;  %398 = vadd.xlane.f32.xlu0 %v397_v31 }
 0x4be   :  { %v382_v34 = vmul.f32 %v379_v33, %v1195_v43 }
 0x4c0   :  { %v386_v35 = vmul.f32 %v1201_v46, %v382_v34 }
 0x4c2   :  { %v393_v36 = vadd.f32 %v389_v12, %v386_v35 }
 0x4c4   :  { %919 = vmatmul.msk.f32.gmra.mxu3 %vm65_vm0, %v392_v28  ;;  %v400_v6 = vsel %vm65_vm0, %v393_v36, 0.0 }
 0x4c5   :  { %401 = vadd.xlane.f32.xlu1 %v400_v6 }
 0x4cc   :  { %920 = vmatmul.msk.f32.gmra.mxu3 %vm65_vm0, %v393_v36 }
 0x4d4   :  { %921 = vmatmul.msk.f32.gmra.mxu3 %vm65_vm0, %v1118_v7 }
 0x4dc   :  { %922 = vmatmul.msk.f32.gmra.mxu3 %vm65_vm0, %v1125_v8 }
 0x50a   :  { %v643_v54 = vpop.permute.xlu2 %642 }
 0x528   :  { %v396_v37 = vpop.xlane.xlu1 %395 }
 0x529   :  { %v403_v38 = vmul.f32 %v396_v37, %v1184_v30 }
 0x52b   :  { %v1249_v39 = vsub.f32 %v391_v16, %v403_v38 }
 0x52d   :  { %v409_v40 = vmul.f32 %v1249_v39, %v1249_v39 }
 0x52f   :  { %v412_v41 = vsel %vm65_vm0, %v409_v40, 0.0 }
 0x530   :  { %v399_v42 = vpop.xlane.xlu0 %398  ;;  %413 = vadd.xlane.f32.xlu0 %v412_v41 }
 0x531   :  { %v404_v43 = vmul.f32 %v399_v42, %v1184_v30 }
 0x533   :  { %v1255_v44 = vsub.f32 %v392_v28, %v404_v43 }
 0x535   :  { %v410_v7 = vmul.f32 %v1255_v44, %v1255_v44 }
 0x537   :  { %v600_v8 = vpop.f32.mrf.mxu3  ;;  %v415_v45 = vsel %vm65_vm0, %v410_v7, 0.0 }
 0x538   :  { %416 = vadd.xlane.f32.xlu1 %v415_v45  ;;  %v402_v46 = vpop.xlane.xlu1 %401  ;;  %v601_v14 = vadd.f32 %v600_v8, %v1267_v61 }
 0x539   :  { %v405_v53 = vmul.f32 %v402_v46, %v1184_v30 }
 0x53b   :  { %v1261_v55 = vsub.f32 %v393_v36, %v405_v53 }
 0x53d   :  { %v411_v56 = vmul.f32 %v1261_v55, %v1261_v55 }
 0x53f   :  { %v603_v57 = vpop.f32.mrf.mxu3  ;;  %v418_v58 = vsel %vm65_vm0, %v411_v56, 0.0 }
 0x540   :  { %419 = vadd.xlane.f32.xlu0 %v418_v58  ;;  %v604_v13 = vadd.f32 %v603_v57, %v1267_v61 }
 0x542   :  { %v976_v15 = vpack.i.bf16 %v601_v14, %v604_v13 }
 0x547   :  { %v606_v60 = vpop.f32.mrf.mxu3 }
 0x548   :  { %v1270_v63 = vadd.f32 %v606_v60, %v1267_v61  ;;  %v60_v60 = vld [vmem:[#allocation2 + $0xc8] sm:$0xff] }
 0x54f   :  { %v609_v62 = vpop.f32.mrf.mxu3 }
 0x550   :  { %v1273_v0 = vadd.f32 %v609_v62, %v1267_v61  ;;  %v59_v62 = vld [vmem:[#allocation2 + $0xc0] sm:$0xff] }
 0x552   :  { %v971_v1 = vpack.i.bf16 %v1270_v63, %v1273_v0 }
 0x557   :  { %v612_v4 = vpop.f32.mrf.mxu3 }
 0x558   :  { %v613_v5 = vadd.f32 %v612_v4, %v1267_v61  ;;  %v55_v4 = vld [vmem:[#allocation2 + $0xa0] sm:$0xff] }
 0x55f   :  { %v615_v10 = vpop.f32.mrf.mxu3 }
 0x560   :  { %v616_v11 = vadd.f32 %v615_v10, %v1267_v61  ;;  %v53_v10 = vld [vmem:[#allocation2 + $0x90] sm:$0xff] }
 0x562   :  { %v966_v12 = vpack.i.bf16 %v613_v5, %v616_v11  ;;  %924 = vmatpush.xpose.msk.msrb.mxu2 %vm65_vm0, %v616_v11  ;;  %v52_v11 = vld [vmem:[#allocation2 + $0x88] sm:$0xff] }
 0x564   :  { %967 = vrot.lane.b32.xlu0 %v966_v12, %s1062_s26  ;;  %v51_v12 = vld [vmem:[#allocation2 + $0x80] sm:$0xff] }
 0x566   :  { %925 = vmatpush.xpose.msk.msrb.mxu2 %vm65_vm0, %v613_v5  ;;  %v54_v5 = vld [vmem:[#allocation2 + $0x98] sm:$0xff] }
 0x56a   :  { %926 = vmatpush.xpose.msk.msrb.mxu2 %vm65_vm0, %v1273_v0 }
 0x56c   :  { %977 = vrot.lane.b32.xlu0 %v976_v15, %s1062_s26  ;;  %v49_v15 = vld [vmem:[#allocation2 + $0x70] sm:$0xff] }
 0x56e   :  { %927 = vmatpush.xpose.msk.msrb.mxu2 %vm65_vm0, %v1270_v63 }
 0x572   :  { %928 = vmatpush.xpose.msk.msrb.mxu2 %vm65_vm0, %v604_v13  ;;  %v50_v13 = vld [vmem:[#allocation2 + $0x78] sm:$0xff] }
 0x576   :  { %929 = vmatpush.xpose.msk.msrb.mxu2 %vm65_vm0, %v601_v14  ;;  %v460_v14 = vperm.slane %v1132_v9, 3 }
 0x5a3   :  { %v414_v16 = vpop.xlane.xlu0 %413 }
 0x5a4   :  { %v421_v17 = vmul.f32 %v414_v16, %v1184_v30 }
 0x5a6   :  { %v424_v18 = vadd.f32 1e-05, %v421_v17  ;;  %v48_v17 = vld [vmem:[#allocation2 + $0x68] sm:$0xff] }
 0x5a8   :  { %1011 = vrsqrt.f32 %v424_v18  ;;  %vm433_vm15 = vweird.f32 %v424_v18 }
 0x5ab   :  { %v417_v19 = vpop.xlane.xlu1 %416 }
 0x5ac   :  { %v422_v22 = vmul.f32 %v417_v19, %v1184_v30 }
 0x5ae   :  { %v1012_v23 = vpop.eup %1011  ;;  %v425_v24 = vadd.f32 1e-05, %v422_v22  ;;  %v1066_v22 = vmov 8.0  }
 0x5af   :  { %v428_v25 = vmul.f32 %v1012_v23, %v424_v18  ;;  %vm434_vm14 = vweird.f32 %v1012_v23  ;;  %v47_v18 = vld [vmem:[#allocation2 + $0x60] sm:$0xff] }
 0x5b0   :  { %1013 = vrsqrt.f32 %v425_v24  ;;  %vm435_vm1 = vmor %vm433_vm15, %vm434_vm14  ;;  %vm443_vm3 = vweird.f32 %v425_v24  ;;  %vm692_vm15 = vcmask 390144  }
 0x5b1   :  { %v429_v26 = vmul.f32 %v1012_v23, %v428_v25 }
 0x5b3   :  { %v430_v27 = vmul.f32 0.5, %v429_v26  ;;  %v420_v28 = vpop.xlane.xlu0 %419 }
 0x5b4   :  { %v423_v29 = vmul.f32 %v420_v28, %v1184_v30 }
 0x5b5   :  { %v431_v31 = vsub.f32 1.5, %v430_v27  ;;  %v149_v27 = vshrl.u32 %v148_v20, 7 }
 0x5b6   :  { %v1014_v33 = vpop.eup %1013  ;;  %v426_v34 = vadd.f32 1e-05, %v423_v29 }
 0x5b7   :  { %v432_v35 = vmul.f32 %v1012_v23, %v431_v31  ;;  %v438_v36 = vmul.f32 %v1014_v33, %v425_v24  ;;  %vm444_vm2 = vweird.f32 %v1014_v33  ;;  %v1067_v24 = vmov 16.0  }
 0x5b8   :  { %1015 = vrsqrt.f32 %v426_v34  ;;  %vm445_vm4 = vmor %vm443_vm3, %vm444_vm2  ;;  %vm453_vm6 = vweird.f32 %v426_v34  ;;  %vm684_vm8 = vcmp.lt.s32.totalorder %v149_v27, 3  ;;  %vm687_vm10 = vcmp.ge.s32.totalorder %v149_v27, 3 }
 0x5b9   :  { %v436_v6 = vsel %vm435_vm1, %v1012_v23, %v432_v35  ;;  %v439_v37 = vmul.f32 %v1014_v33, %v438_v36  ;;  %1017 = vrcp.f32 %v1066_v22  ;;  %vm1307_vm12 = vmand %vm684_vm8, %vm685_vm9  ;;  %vm528_vm3 = vcmask 1040384  }
 0x5ba   :  { %v457_v38 = vmul.f32 %v436_v6, %v1249_v39  ;;  %1019 = vrcp.f32 %v1067_v24  ;;  %vm689_vm13 = vmand %vm687_vm10, %vm688_vm11 }
 0x5bb   :  { %v440_v40 = vmul.f32 0.5, %v439_v37  ;;  %vm690_vm14 = vmor %vm1307_vm12, %vm689_vm13  ;;  %vm892_vm12 = vcmask 19456  }
 0x5bc   :  { %914 = vmatmul.msk.f32.vlgmr.msra.gmra.mxu2 %vm65_vm0, %v457_v38 }
 0x5bd   :  { %v441_v41 = vsub.f32 1.5, %v440_v40 }
 0x5be   :  { %v1016_v42 = vpop.eup %1015 }
 0x5bf   :  { %v448_v30 = vmul.f32 %v1016_v42, %v426_v34  ;;  %v442_v43 = vmul.f32 %v1014_v33, %v441_v41  ;;  %vm454_vm5 = vweird.f32 %v1016_v42  ;;  %v1018_v28 = vpop.eup %1017 }
 0x5c0   :  { %vm455_vm7 = vmor %vm453_vm6, %vm454_vm5  ;;  %v1020_v29 = vpop.eup %1019  ;;  %v506_v35 = vmul.f32 8.0, %v1018_v28  ;;  %vm510_vm1 = vweird.f32 %v1018_v28  ;;  %vm561_vm5 = vcmask 1041408   ;;  %vm842_vm6 = vcmask 18432  }
 0x5c1   :  { %v449_v7 = vmul.f32 %v1016_v42, %v448_v30  ;;  %v446_v8 = vsel %vm445_vm4, %v1014_v33, %v442_v43  ;;  %v521_v36 = vmul.f32 16.0, %v1020_v29  ;;  %vm525_vm2 = vweird.f32 %v1020_v29 }
 0x5c2   :  { %v458_v45 = vmul.f32 %v446_v8, %v1255_v44  ;;  %v62_v44 = vld [vmem:[#allocation2 + $0xd8] sm:$0xff]  ;;  %v507_v41 = vsub.f32 1.0, %v506_v35  ;;  %vm722_vm4 = vcmask 392192  }
 0x5c3   :  { %v450_v46 = vmul.f32 0.5, %v449_v7  ;;  %531 = vmatpush.msrb.mxu0 %v62_v44 }
 0x5c4   :  { %915 = vmatmul.msk.f32.gmra.mxu2 %vm65_vm0, %v458_v45  ;;  %v508_v8 = vmul.f32 %v1018_v28, %v507_v41 }
 0x5c5   :  { %v451_v51 = vsub.f32 1.5, %v450_v46  ;;  %532 = vmatpush.msrb.mxu0 %v61_v59 }
 0x5c7   :  { %v452_v39 = vmul.f32 %v1016_v42, %v451_v51  ;;  %533 = vmatpush.msrb.mxu0 %v60_v60 }
 0x5c9   :  { %v456_v52 = vsel %vm455_vm7, %v1016_v42, %v452_v39  ;;  %534 = vmatpush.msrb.mxu0 %v59_v62  ;;  %v522_v42 = vsub.f32 1.0, %v521_v36 }
 0x5ca   :  { %v459_v53 = vmul.f32 %v456_v52, %v1261_v55  ;;  %v57_v55 = vld [vmem:[#allocation2 + $0xb0] sm:$0xff] }
 0x5cb   :  { %535 = vmatpush.msrb.mxu0 %v58_v2  ;;  %v523_v45 = vmul.f32 %v1020_v29, %v522_v42 }
 0x5cc   :  { %916 = vmatmul.msk.f32.gmra.mxu2 %vm65_vm0, %v459_v53 }
 0x5cd   :  { %536 = vmatpush.msrb.mxu0 %v57_v55 }
 0x5cf   :  { %537 = vmatpush.msrb.mxu0 %v56_v3 }
 0x5d1   :  { %538 = vmatpush.msrb.mxu0 %v55_v4  ;;  %v981_v4 = vpack.i.bf16 %v1209_v48, %v1205_v47  ;;  %v530_v47 = vperm.slane %v1132_v9, 4 }
 0x5d3   :  { %539 = vmatpush.msrb.mxu0 %v54_v5  ;;  %982 = vrot.lane.b32.xlu0 %v981_v4, %s1064_s27  ;;  %v986_v5 = vpack.i.bf16 %v1217_v50, %v1213_v49 }
 0x5d4   :  { %930 = vmatmul.msk.f32.vlgmr.msrb.gmra.mxu2 %vm65_vm0, %v643_v54  ;;  %v509_v54 = vadd.f32 %v1018_v28, %v508_v8 }
 0x5d5   :  { %540 = vmatpush.msrb.mxu0 %v53_v10 }
 0x5d6   :  { %v968_v56 = vpop.permute.xlu0 %967  ;;  %v511_v59 = vsel %vm510_vm1, %v1018_v28, %v509_v54 }
 0x5d7   :  { %v970_v57 = vunpack.i.h.bf16 %v968_v56  ;;  %v969_v58 = vunpack.i.l.bf16 %v968_v56  ;;  %541 = vmatpush.msrb.mxu0 %v52_v11  ;;  %v524_v56 = vadd.f32 %v1020_v29, %v523_v45 }
 0x5d9   :  { %736 = vmatpush.msra.mxu1 %v969_v58  ;;  %542 = vmatpush.msrb.mxu0 %v51_v12  ;;  %v526_v60 = vsel %vm525_vm2, %v1020_v29, %v524_v56  ;;  %v1068_v56 = vmov 3.0  }
 0x5db   :  { %737 = vmatpush.msra.mxu1 %v970_v57  ;;  %543 = vmatpush.msrb.mxu0 %v50_v13 }
 0x5dc   :  { %763 = vrot.lane.b32.xlu0 %v1267_v61, %s1064_s27 }
 0x5dd   :  { %544 = vmatpush.msrb.mxu0 %v49_v15 }
 0x5de   :  { %v978_v15 = vpop.permute.xlu0 %977 }
 0x5df   :  { %545 = vmatpush.msrb.mxu0 %v48_v17  ;;  %v980_v17 = vunpack.i.h.bf16 %v978_v15 }
 0x5e1   :  { %546 = vmatpush.msrb.mxu0 %v47_v18 }
 0x63f   :  { %v487_v16 = vpop.f32.mrf.mxu2 }
 0x640   :  { %v488_v19 = vadd.f32 %v487_v16, %v460_v14  ;;  %v979_v16 = vunpack.i.l.bf16 %v978_v15 }
 0x642   :  { %v496_v23 = vmax.f32 %v488_v19, 0.0 }
 0x644   :  { %v499_v26 = vrot.slane %v496_v23, 4 }
 0x645   :  { %v983_v9 = vpop.permute.xlu0 %982 }
 0x646   :  { %v500_v31 = vadd.f32 %v499_v26, %v496_v23  ;;  %v985_v18 = vunpack.i.h.bf16 %v983_v9  ;;  %v984_v19 = vunpack.i.l.bf16 %v983_v9 }
 0x647   :  { %v490_v25 = vpop.f32.mrf.mxu2 }
 0x648   :  { %v491_v33 = vadd.f32 %v490_v25, %v460_v14  ;;  %v501_v38 = vrot.slane %v500_v31, 2  ;;  %781 = vmatpush.msra.mxu0 %v984_v19 }
 0x64a   :  { %v497_v20 = vmax.f32 %v491_v33, 0.0  ;;  %v502_v43 = vadd.f32 %v501_v38, %v500_v31  ;;  %782 = vmatpush.msra.mxu0 %v985_v18 }
 0x64c   :  { %v503_v52 = vrot.slane %v502_v43, 1 }
 0x64e   :  { %v504_v58 = vadd.f32 %v503_v52, %v502_v43  ;;  %v764_v29 = vpop.permute.xlu0 %763 }
 0x64f   :  { %v493_v34 = vpop.f32.mrf.mxu2 }
 0x650   :  { %v494_v6 = vadd.f32 %v493_v34, %v460_v14  ;;  %v512_v2 = vmul.f32 %v511_v59, %v504_v58 }
 0x652   :  { %v498_v40 = vmax.f32 %v494_v6, 0.0 }
 0x654   :  { %v513_v30 = vadd.f32 %v498_v40, %v497_v20 }
 0x656   :  { %v514_v7 = vrot.slane %v513_v30, 4 }
 0x657   :  { %v681_v21 = vpop.f32.mrf.mxu2 }
 0x658   :  { %v515_v46 = vadd.f32 %v514_v7, %v513_v30  ;;  %v691_v51 = vsel %vm690_vm14, %v681_v21, -1e+30  ;;  %v34_v7 = vld [vmem:[%s1351_s2 + $0x20] sm:$0xff] }
 0x659   :  { %v693_v39 = vsel %vm692_vm15, %v691_v51, -inf }
 0x65a   :  { %v516_v53 = vrot.slane %v515_v46, 2  ;;  %694 = vmax.xlane.f32.xlu1 %v693_v39 }
 0x65c   :  { %v517_v57 = vadd.f32 %v516_v53, %v515_v46 }
 0x65e   :  { %v518_v44 = vrot.slane %v517_v57, 1 }
 0x660   :  { %v519_v62 = vadd.f32 %v518_v44, %v517_v57 }
 0x662   :  { %v527_v55 = vmul.f32 %v526_v60, %v519_v62 }
 0x664   :  { %v529_v3 = vsel %vm528_vm3, %v512_v2, %v527_v55 }
 0x665   :  { %547 = vmatmul.f32.vlgmr.msrb.gmra.mxu0 %v529_v3 }
 0x673   :  { %972 = vrot.lane.b32.xlu1 %v971_v1, %s1062_s26 }
 0x67b   :  { %987 = vrot.lane.b32.xlu1 %v986_v5, %s1064_s27 }
 0x6cd   :  { %v695_v10 = vpop.xlane.xlu1 %694 }
 0x6ce   :  { %v696_v11 = vsub.f32 %v691_v51, %v695_v10 }
 0x6d0   :  { %v697_v12 = vmul.f32 1.442695, %v696_v11 }
 0x6d2   :  { %1021 = vpow2.f32 %v697_v12 }
 0x6d8   :  { %v1022_v13 = vpop.eup %1021 }
 0x6d9   :  { %v699_v63 = vsel %vm692_vm15, %v1022_v13, 0.0 }
 0x6da   :  { %700 = vadd.xlane.f32.xlu2 %v699_v63 }
 0x6e2   :  { %v548_v48 = vpop.f32.mrf.mxu0 }
 0x6e3   :  { %v549_v0 = vadd.f32 %v548_v48, %v530_v47 }
 0x6e5   :  { %v973_v1 = vpop.permute.xlu1 %972  ;;  %v556_v14 = vrot.slane %v549_v0, 6  ;;  %v552_v49 = vrot.slane %v549_v0, 7  ;;  %v563_v20 = vrot.slane %v549_v0, 1 }
 0x6e6   :  { %v974_v50 = vunpack.i.l.bf16 %v973_v1  ;;  %v975_v61 = vunpack.i.h.bf16 %v973_v1 }
 0x6e7   :  { %557 = vrot.lane.b32.xlu0 %v556_v14, %s1063_s1  ;;  %553 = vrot.lane.b32.xlu1 %v552_v49, %s1062_s26 }
 0x6e8   :  { %738 = vmatpush.msra.mxu1 %v974_v50 }
 0x6ea   :  { %739 = vmatpush.msra.mxu1 %v975_v61 }
 0x6ec   :  { %740 = vmatpush.msra.mxu1 %v979_v16 }
 0x6ed   :  { %v988_v22 = vpop.permute.xlu1 %987 }
 0x6ee   :  { %741 = vmatpush.msra.mxu1 %v980_v17  ;;  %v990_v23 = vunpack.i.h.bf16 %v988_v22  ;;  %v989_v24 = vunpack.i.l.bf16 %v988_v22 }
 0x6ef   :  { %568 = vrot.lane.b32.xlu1 %v552_v49, %s1063_s1 }
 0x6f0   :  { %783 = vmatpush.msra.mxu0 %v989_v24 }
 0x6f2   :  { %565 = vrot.lane.b32.xlu2 %v549_v0, %s1062_s26  ;;  %784 = vmatpush.msra.mxu0 %v990_v23 }
 0x74d   :  { %v701_v25 = vpop.xlane.xlu2 %700 }
 0x74e   :  { %1023 = vrcp.f32 %v701_v25 }
 0x754   :  { %v1024_v26 = vpop.eup %1023 }
 0x755   :  { %v703_v27 = vmul.f32 %v1024_v26, %v1022_v13  ;;  %v566_v37 = vpop.permute.xlu2 %565 }
 0x756   :  { %v571_v42 = vsel %vm528_vm3, %v563_v20, %v566_v37 }
 0x757   :  { %931 = vmatmul.msk.f32.vlgmr.msra.gmra.mxu1 %vm722_vm4, %v703_v27 }
 0x759   :  { %v554_v31 = vpop.permute.xlu1 %553  ;;  %v558_v36 = vpop.permute.xlu0 %557 }
 0x75a   :  { %v560_v6 = vsel %vm528_vm3, %v549_v0, %v554_v31 }
 0x75b   :  { %v562_v41 = vsel %vm561_vm5, %v560_v6, %v558_v36 }
 0x761   :  { %v569_v40 = vpop.permute.xlu1 %568 }
 0x762   :  { %v572_v30 = vsel %vm561_vm5, %v571_v42, %v569_v40 }
 0x7d4   :  { %v743_v28 = vpop.f32.mrf.mxu1 }
 0x7d5   :  { %932 = vmatmul.msk.f32.vlgmr.msra.gmra.mxu0 %vm65_vm0, %v743_v28 }
 0x852   :  { %v786_v33 = vpop.f32.mrf.mxu0 }
 0x853   :  { %v787_v34 = vadd.f32 %v786_v33, %v764_v29 }
 0x855   :  { %v789_v35 = vadd.f32 %v787_v34, %v1235_v32 }
 0x857   :  { %v791_v38 = vrot.slane %v789_v35, 3  ;;  %935 = vmatpush.xpose.msk.msrb.mxu1 %vm65_vm0, %v789_v35 }
 0x859   :  { %933 = vmatpush.xpose.msk.msrb.mxu0 %vm65_vm0, %v791_v38 }
 0x85a   :  { %936 = vmatmul.msk.f32.vlgmr.msrb.gmra.mxu1 %vm65_vm0, %v562_v41 }
 0x85c   :  { %934 = vmatmul.msk.f32.vlgmr.msrb.gmra.mxu0 %vm65_vm0, %v572_v30  ;;  %vm875_vm0 = vcmask 1042432  }
 0x8d7   :  { %v839_v32 = vpop.f32.mrf.mxu1 }
 0x8d9   :  { %v814_v43 = vpop.f32.mrf.mxu0 }
 0x8da   :  { %v840_v21 = vadd.f32 %v839_v32, %v814_v43 }
 0x8dc   :  { %v843_v8 = vsel %vm842_vm6, %v840_v21, -inf  ;;  %v870_v45 = vmul.f32 %v840_v21, %v34_v7 }
 0x8dd   :  { %844 = vmax.xlane.f32.xlu0 %v843_v8 }
 0x8de   :  { %v871_v46 = vsel %vm842_vm6, %v870_v45, 0.0 }
 0x8df   :  { %872 = vadd.xlane.f32.xlu2 %v871_v46 }
 0x950   :  { %v845_v51 = vpop.xlane.xlu0 %844 }
 0x951   :  { %v846_v39 = vsub.f32 %v840_v21, %v845_v51 }
 0x952   :  { %v873_v4 = vpop.xlane.xlu2 %872 }
 0x953   :  { %v847_v52 = vmul.f32 1.442695, %v846_v39 }
 0x955   :  { %1025 = vpow2.f32 %v847_v52 }
 0x956   :  { %1027 = vrcp.f32 %v1068_v56 }
 0x95b   :  { %v1026_v53 = vpop.eup %1025 }
 0x95c   :  { %v849_v54 = vsel %vm842_vm6, %v1026_v53, 0.0  ;;  %v1028_v58 = vpop.eup %1027 }
 0x95d   :  { %850 = vadd.xlane.f32.xlu1 %v849_v54  ;;  %v884_v62 = vmul.f32 3.0, %v1028_v58  ;;  %vm888_vm10 = vweird.f32 %v1028_v58 }
 0x95f   :  { %v885_v5 = vsub.f32 1.0, %v884_v62 }
 0x961   :  { %v886_v63 = vmul.f32 %v1028_v58, %v885_v5 }
 0x963   :  { %v887_v49 = vadd.f32 %v1028_v58, %v886_v63 }
 0x965   :  { %v889_v17 = vsel %vm888_vm10, %v1028_v58, %v887_v49 }
 0x9d0   :  { %v851_v57 = vpop.xlane.xlu1 %850 }
 0x9d1   :  { %1029 = vrcp.f32 %v851_v57  ;;  %v863_v0 = vand.u32 2147483648, %v851_v57  ;;  %vm857_vm8 = vweird.f32 %v851_v57  ;;  %v861_v1 = vand.u32 2147483647, %v851_v57 }
 0x9d2   :  { %1031 = vlog2.f32 %v851_v57 }
 0x9d3   :  { %v864_v61 = vor.u32 1.1754944e-38, %v863_v0  ;;  %vm862_vm11 = vcmp.eq.f32.partialorder %v861_v1, 8.507059e+37 }
 0x9d7   :  { %v1030_v44 = vpop.eup %1029 }
 0x9d8   :  { %v1032_v59 = vpop.eup %1031  ;;  %v853_v60 = vmul.f32 %v1030_v44, %v851_v57  ;;  %vm858_vm7 = vweird.f32 %v1030_v44 }
 0x9d9   :  { %v868_v2 = vmul.f32 0.6931472, %v1032_v59  ;;  %vm859_vm9 = vmor %vm857_vm8, %vm858_vm7 }
 0x9da   :  { %v854_v55 = vsub.f32 1.0, %v853_v60 }
 0x9db   :  { %v869_v3 = vadd.f32 %v868_v2, %v845_v51 }
 0x9dc   :  { %v855_v11 = vmul.f32 %v1030_v44, %v854_v55 }
 0x9dd   :  { %v874_v10 = vsub.f32 %v869_v3, %v873_v4 }
 0x9de   :  { %v856_v47 = vadd.f32 %v1030_v44, %v855_v11 }
 0x9df   :  { %v876_v12 = vsel %vm875_vm0, %v874_v10, 0.0 }
 0x9e0   :  { %v877_v13 = vrot.slane %v876_v12, 4  ;;  %v860_v50 = vsel %vm859_vm9, %v1030_v44, %v856_v47 }
 0x9e1   :  { %v865_v9 = vsel %vm862_vm11, %v864_v61, %v860_v50 }
 0x9e2   :  { %v878_v48 = vadd.f32 %v877_v13, %v876_v12  ;;  %v866_v19 = vmul.f32 %v1026_v53, %v865_v9 }
 0x9e4   :  { %v879_v14 = vrot.slane %v878_v48, 2 }
 0x9e6   :  { %v880_v15 = vadd.f32 %v879_v14, %v878_v48 }
 0x9e8   :  { %v881_v16 = vrot.slane %v880_v15, 1 }
 0x9ea   :  { %v882_v18 = vadd.f32 %v881_v16, %v880_v15 }
 0x9ec   :  { %v890_v22 = vmul.f32 %v889_v17, %v882_v18 }
 0x9ee   :  { %v891_v23 = vsel %vm875_vm0, %v866_v19, %v890_v22 }
 0x9ef   :  { %893 = vst.msk [vmem:[%s1352_s3] sm:$0xf] %vm892_vm12, %v891_v23 }
 0x9f0   :  { %898 = vsyncpa [#allocation3], 1 }

</bundles_post_ra>
